<compile_context>
chip_gen: v5e
topology: v5e:2x2
jax: 0.10.0
libtpu: 0.0.40
codegen_flags: <defaults>
</compile_context>

<pallas_src>
import functools

import numpy as np
import jax
import jax.numpy as jnp
from jax import lax
from jax.experimental import pallas as pl
from jax.experimental.pallas import tpu as pltpu


def _boundary_masks(H, W, K, dtype):
    """(K*K, H*W) {0,1} masks: tap (kh, kw) is valid at flat position h*W + w.

    Built host-side with numpy (trace-time constant) so the kernel needs no
    iota / integer div-mod and no zero-padding pass at all.
    """
    p = K // 2
    hh, ww = np.meshgrid(np.arange(H), np.arange(W), indexing="ij")
    masks = []
    for kh in range(K):
        for kw in range(K):
            dh, dw = kh - p, kw - p
            valid = ((hh + dh >= 0) & (hh + dh < H) &
                     (ww + dw >= 0) & (ww + dw < W))
            masks.append(valid.reshape(-1))
    return jnp.asarray(np.stack(masks, axis=0), dtype=dtype)


def _conv_ps_kernel(x_ref, w_ref, b_ref, m_ref, o_ref, *, H, W, K, Cin, NB):
    """One batch block (NB images) per grid step.

    x_ref : (NB, Cin, H*W)     flattened NCHW input            (VMEM)
    w_ref : (Cout4, K*K*Cin)   weights, contraction dim last   (VMEM)
    b_ref : (Cout4, 1)         bias                            (VMEM)
    m_ref : (K*K, H*W)         boundary masks (0/1)            (VMEM)
    o_ref : (NB, Cout4, H*W)   conv output, channel-major      (VMEM)
    """
    p = K // 2
    x = x_ref[...]                                   # (NB, Cin, HW)

    # Build the im2col block: one lane-shifted, boundary-masked copy of the
    # whole batch block per receptive-field tap.  jnp.roll with a static shift
    # lowers to lane rotates; wrapped lanes (image borders) are zeroed by the
    # precomputed mask, so no explicit padding pass is needed.  The center tap
    # (dh == dw == 0) has an all-ones mask and skips the multiply.
    pieces = []
    t = 0
    for kh in range(K):
        for kw in range(K):
            dh, dw = kh - p, kw - p
            d = dh * W + dw                          # flat lane shift of this tap
            shifted = x if d == 0 else jnp.roll(x, -d, axis=2)
            if dh == 0 and dw == 0:
                piece = shifted
            else:
                # (1, HW) mask broadcasts over (NB, Cin, HW)
                piece = shifted * m_ref[pl.ds(t, 1), :]
            pieces.append(piece)
            t += 1
    patches = jnp.concatenate(pieces, axis=1)        # (NB, K*K*Cin, HW)

    w = w_ref[...]                                   # (Cout4, K*K*Cin)
    bias = b_ref[...]                                # (Cout4, 1)

    # One MXU contraction per image (static unrolled loop over the block);
    # each result is (Cout4, HW) with the lane axis a multiple of 128, so the
    # store below is a full-width (unmasked) vst and needs no transpose.
    for b in range(NB):
        acc = jnp.dot(w, patches[b], preferred_element_type=jnp.float32)
        acc = acc + bias                             # bias broadcast over lanes
        o_ref[b] = acc.astype(o_ref.dtype)


def conv2d_pallas(x_flat, w_mat, bias2d, masks, *, H, W, K, Cin,
                  block_bytes_budget=2 << 20):
    """Runs the fused im2col conv over the batch dimension in blocks of NB."""
    N = x_flat.shape[0]
    HW = H * W
    Cout4, KKC = w_mat.shape
    itemsize = jnp.dtype(x_flat.dtype).itemsize

    # Pick the batch block size: as many images per grid step as fit a small
    # VMEM budget (input block + im2col patches + output block), and force NB
    # to divide N so every block is full (no partial-block masking needed).
    per_elem = (Cin * HW + Cout4 * HW + KKC * HW) * itemsize
    NB = max(1, min(N, block_bytes_budget // max(per_elem, 1)))
    while N % NB:
        NB -= 1

    kernel = functools.partial(_conv_ps_kernel, H=H, W=W, K=K, Cin=Cin, NB=NB)

    cost = pl.CostEstimate(
        flops=2 * N * HW * KKC * Cout4,
        transcendentals=0,
        bytes_accessed=(x_flat.size + w_mat.size + bias2d.size + masks.size
                        + N * Cout4 * HW) * itemsize,
    )

    return pl.pallas_call(
        kernel,
        out_shape=jax.ShapeDtypeStruct((N, Cout4, HW), x_flat.dtype),
        grid_spec=pltpu.PrefetchScalarGridSpec(
            num_scalar_prefetch=0,
            grid=(N // NB,),
            in_specs=[
                pl.BlockSpec((NB, Cin, HW), lambda n: (n, 0, 0)),
                pl.BlockSpec((Cout4, KKC), lambda n: (0, 0)),
                pl.BlockSpec((Cout4, 1), lambda n: (0, 0)),
                pl.BlockSpec((K * K, HW), lambda n: (0, 0)),
            ],
            out_specs=pl.BlockSpec((NB, Cout4, HW), lambda n: (n, 0, 0)),
        ),
        compiler_params=pltpu.CompilerParams(
            dimension_semantics=("parallel",)),
        cost_estimate=cost,
    )(x_flat, w_mat, bias2d, masks)


def pixel_shuffle_nchw(x, r=2):
    """PyTorch nn.PixelShuffle semantics on an NCHW tensor."""
    N, Cr2, H, W = x.shape
    C = Cr2 // (r * r)
    x = x.reshape(N, C, r, r, H, W)
    x = jnp.transpose(x, (0, 1, 4, 2, 5, 3))        # (N, C, H, r, W, r)
    return x.reshape(N, C, H * r, W * r)


def conv_pixel_shuffle(x_nchw, w_oihw, bias, *, kernel_size):
    """Forward pass of ConvPixelShuffle.  Input/output are NCHW (PyTorch)."""
    N, Cin, H, W = x_nchw.shape
    Cout4 = w_oihw.shape[0]
    K = kernel_size

    # Flatten spatial onto lanes; stays channel-major (free, contiguous reshape).
    x_flat = x_nchw.reshape(N, Cin, H * W)
    # PyTorch conv weight (Cout4, Cin, K, K) -> (Cout4, K*K*Cin); contraction
    # index ordered (kh, kw, ci) to match the im2col rows built in the kernel.
    w_mat = jnp.transpose(w_oihw, (0, 2, 3, 1)).reshape(Cout4, K * K * Cin)
    w_mat = w_mat.astype(x_nchw.dtype)
    bias2d = bias.reshape(Cout4, 1).astype(x_nchw.dtype)
    masks = _boundary_masks(H, W, K, x_nchw.dtype)

    y = conv2d_pallas(x_flat, w_mat, bias2d, masks,
                      H=H, W=W, K=K, Cin=Cin)       # (N, Cout4, H*W)
    y = y.reshape(N, Cout4, H, W)                   # free (contiguous) reshape
    # PixelShuffle(2): the one remaining data-movement op outside the kernel.
    return pixel_shuffle_nchw(y, r=2)               # (N, Cout, 2H, 2W)


def _reference(x_nchw, w_oihw, bias, *, kernel_size):
    """Pure-JAX reference (lax.conv) for validation."""
    p = kernel_size // 2
    y = lax.conv_general_dilated(
        x_nchw, w_oihw,
        window_strides=(1, 1),
        padding=[(p, p), (p, p)],
        dimension_numbers=("NCHW", "OIHW", "NCHW"),
    ) + bias.reshape(1, -1, 1, 1)
    return pixel_shuffle_nchw(y, r=2)


if __name__ == "__main__":
    # Module config: ConvPixelShuffle(cin=4, cout=4, kernel_size=3)
    cin, cout, kernel_size = 4, 4, 3
    N, H, W = 2, 16, 16

    key = jax.random.PRNGKey(0)
    kx, kwt, kb = jax.random.split(key, 3)

    x = jax.random.normal(kx, (N, cin, H, W), dtype=jnp.float32)
    # Deterministic synthetic parameters (PyTorch conv weight layout: OIHW).
    w = jax.random.normal(kwt, (cout * 4, cin, kernel_size, kernel_size),
                          dtype=jnp.float32) * 0.1
    b = jax.random.normal(kb, (cout * 4,), dtype=jnp.float32) * 0.1

    out = conv_pixel_shuffle(x, w, b, kernel_size=kernel_size)
    out = jax.block_until_ready(out)

    ref = _reference(x, w, b, kernel_size=kernel_size)
    assert out.shape == (N, cout, 2 * H, 2 * W), out.shape
    assert jnp.allclose(out, ref, atol=1e-4, rtol=1e-4), "mismatch vs reference"

    print("KERNEL_OK")
</pallas_src>

<mosaic_0001>
module attributes {stable_mosaic.version = 11 : i64} {
  func.func @_conv_ps_kernel(%arg0: i32, %arg1: memref<2x4x256xf32, #tpu.memory_space<vmem>>, %arg2: memref<16x36xf32, #tpu.memory_space<vmem>>, %arg3: memref<16x1xf32, #tpu.memory_space<vmem>>, %arg4: memref<9x256xf32, #tpu.memory_space<vmem>>, %arg5: memref<2x16x256xf32, #tpu.memory_space<vmem>>) attributes {dimension_semantics = [#tpu.dimension_semantics<parallel>], iteration_bounds = array<i64: 1>, scalar_prefetch = 0 : i64, scratch_operands = 0 : i64, tpu.core_type = #tpu.core_type<tc>, window_params = [{transform_indices = @transform_0, window_bounds = array<i64: 2, 4, 256>}, {pipeline_mode = #tpu.pipeline_mode<synchronous>, transform_indices = @transform_1, window_bounds = array<i64: 16, 36>}, {pipeline_mode = #tpu.pipeline_mode<synchronous>, transform_indices = @transform_2, window_bounds = array<i64: 16, 1>}, {pipeline_mode = #tpu.pipeline_mode<synchronous>, transform_indices = @transform_3, window_bounds = array<i64: 9, 256>}, {transform_indices = @transform_4, window_bounds = array<i64: 2, 16, 256>}]} {
    %c0 = arith.constant 0 : index
    %c0_0 = arith.constant 0 : index
    %c0_1 = arith.constant 0 : index
    %0 = vector.load %arg1[%c0, %c0_0, %c0_1] : memref<2x4x256xf32, #tpu.memory_space<vmem>>, vector<2x4x256xf32>
    %1 = vector.extract_strided_slice %0 {offsets = [0, 0, 239], sizes = [2, 4, 17], strides = [1, 1, 1]} : vector<2x4x256xf32> to vector<2x4x17xf32>
    %2 = vector.extract_strided_slice %0 {offsets = [0, 0, 0], sizes = [2, 4, 239], strides = [1, 1, 1]} : vector<2x4x256xf32> to vector<2x4x239xf32>
    %3 = tpu.concatenate %1, %2 in 2 : vector<2x4x17xf32>, vector<2x4x239xf32> -> vector<2x4x256xf32>
    %c0_2 = arith.constant 0 : index
    %c0_3 = arith.constant 0 : index
    %4 = vector.load %arg4[%c0_2, %c0_3] : memref<9x256xf32, #tpu.memory_space<vmem>>, vector<1x256xf32>
    %5 = vector.shape_cast %4 : vector<1x256xf32> to vector<1x1x256xf32>
    %6 = vector.broadcast %5 : vector<1x1x256xf32> to vector<2x4x256xf32>
    %7 = arith.mulf %3, %6 : vector<2x4x256xf32>
    %8 = vector.extract_strided_slice %0 {offsets = [0, 0, 240], sizes = [2, 4, 16], strides = [1, 1, 1]} : vector<2x4x256xf32> to vector<2x4x16xf32>
    %9 = vector.extract_strided_slice %0 {offsets = [0, 0, 0], sizes = [2, 4, 240], strides = [1, 1, 1]} : vector<2x4x256xf32> to vector<2x4x240xf32>
    %10 = tpu.concatenate %8, %9 in 2 : vector<2x4x16xf32>, vector<2x4x240xf32> -> vector<2x4x256xf32>
    %c1 = arith.constant 1 : index
    %c0_4 = arith.constant 0 : index
    %11 = vector.load %arg4[%c1, %c0_4] : memref<9x256xf32, #tpu.memory_space<vmem>>, vector<1x256xf32>
    %12 = vector.shape_cast %11 : vector<1x256xf32> to vector<1x1x256xf32>
    %13 = vector.broadcast %12 : vector<1x1x256xf32> to vector<2x4x256xf32>
    %14 = arith.mulf %10, %13 : vector<2x4x256xf32>
    %15 = vector.extract_strided_slice %0 {offsets = [0, 0, 241], sizes = [2, 4, 15], strides = [1, 1, 1]} : vector<2x4x256xf32> to vector<2x4x15xf32>
    %16 = vector.extract_strided_slice %0 {offsets = [0, 0, 0], sizes = [2, 4, 241], strides = [1, 1, 1]} : vector<2x4x256xf32> to vector<2x4x241xf32>
    %17 = tpu.concatenate %15, %16 in 2 : vector<2x4x15xf32>, vector<2x4x241xf32> -> vector<2x4x256xf32>
    %c2 = arith.constant 2 : index
    %c0_5 = arith.constant 0 : index
    %18 = vector.load %arg4[%c2, %c0_5] : memref<9x256xf32, #tpu.memory_space<vmem>>, vector<1x256xf32>
    %19 = vector.shape_cast %18 : vector<1x256xf32> to vector<1x1x256xf32>
    %20 = vector.broadcast %19 : vector<1x1x256xf32> to vector<2x4x256xf32>
    %21 = arith.mulf %17, %20 : vector<2x4x256xf32>
    %22 = vector.extract_strided_slice %0 {offsets = [0, 0, 255], sizes = [2, 4, 1], strides = [1, 1, 1]} : vector<2x4x256xf32> to vector<2x4x1xf32>
    %23 = vector.extract_strided_slice %0 {offsets = [0, 0, 0], sizes = [2, 4, 255], strides = [1, 1, 1]} : vector<2x4x256xf32> to vector<2x4x255xf32>
    %24 = tpu.concatenate %22, %23 in 2 : vector<2x4x1xf32>, vector<2x4x255xf32> -> vector<2x4x256xf32>
    %c3 = arith.constant 3 : index
    %c0_6 = arith.constant 0 : index
    %25 = vector.load %arg4[%c3, %c0_6] : memref<9x256xf32, #tpu.memory_space<vmem>>, vector<1x256xf32>
    %26 = vector.shape_cast %25 : vector<1x256xf32> to vector<1x1x256xf32>
    %27 = vector.broadcast %26 : vector<1x1x256xf32> to vector<2x4x256xf32>
    %28 = arith.mulf %24, %27 : vector<2x4x256xf32>
    %29 = vector.extract_strided_slice %0 {offsets = [0, 0, 1], sizes = [2, 4, 255], strides = [1, 1, 1]} : vector<2x4x256xf32> to vector<2x4x255xf32>
    %30 = vector.extract_strided_slice %0 {offsets = [0, 0, 0], sizes = [2, 4, 1], strides = [1, 1, 1]} : vector<2x4x256xf32> to vector<2x4x1xf32>
    %31 = tpu.concatenate %29, %30 in 2 : vector<2x4x255xf32>, vector<2x4x1xf32> -> vector<2x4x256xf32>
    %c5 = arith.constant 5 : index
    %c0_7 = arith.constant 0 : index
    %32 = vector.load %arg4[%c5, %c0_7] : memref<9x256xf32, #tpu.memory_space<vmem>>, vector<1x256xf32>
    %33 = vector.shape_cast %32 : vector<1x256xf32> to vector<1x1x256xf32>
    %34 = vector.broadcast %33 : vector<1x1x256xf32> to vector<2x4x256xf32>
    %35 = arith.mulf %31, %34 : vector<2x4x256xf32>
    %36 = vector.extract_strided_slice %0 {offsets = [0, 0, 15], sizes = [2, 4, 241], strides = [1, 1, 1]} : vector<2x4x256xf32> to vector<2x4x241xf32>
    %37 = vector.extract_strided_slice %0 {offsets = [0, 0, 0], sizes = [2, 4, 15], strides = [1, 1, 1]} : vector<2x4x256xf32> to vector<2x4x15xf32>
    %38 = tpu.concatenate %36, %37 in 2 : vector<2x4x241xf32>, vector<2x4x15xf32> -> vector<2x4x256xf32>
    %c6 = arith.constant 6 : index
    %c0_8 = arith.constant 0 : index
    %39 = vector.load %arg4[%c6, %c0_8] : memref<9x256xf32, #tpu.memory_space<vmem>>, vector<1x256xf32>
    %40 = vector.shape_cast %39 : vector<1x256xf32> to vector<1x1x256xf32>
    %41 = vector.broadcast %40 : vector<1x1x256xf32> to vector<2x4x256xf32>
    %42 = arith.mulf %38, %41 : vector<2x4x256xf32>
    %43 = vector.extract_strided_slice %0 {offsets = [0, 0, 16], sizes = [2, 4, 240], strides = [1, 1, 1]} : vector<2x4x256xf32> to vector<2x4x240xf32>
    %44 = vector.extract_strided_slice %0 {offsets = [0, 0, 0], sizes = [2, 4, 16], strides = [1, 1, 1]} : vector<2x4x256xf32> to vector<2x4x16xf32>
    %45 = tpu.concatenate %43, %44 in 2 : vector<2x4x240xf32>, vector<2x4x16xf32> -> vector<2x4x256xf32>
    %c7 = arith.constant 7 : index
    %c0_9 = arith.constant 0 : index
    %46 = vector.load %arg4[%c7, %c0_9] : memref<9x256xf32, #tpu.memory_space<vmem>>, vector<1x256xf32>
    %47 = vector.shape_cast %46 : vector<1x256xf32> to vector<1x1x256xf32>
    %48 = vector.broadcast %47 : vector<1x1x256xf32> to vector<2x4x256xf32>
    %49 = arith.mulf %45, %48 : vector<2x4x256xf32>
    %50 = vector.extract_strided_slice %0 {offsets = [0, 0, 17], sizes = [2, 4, 239], strides = [1, 1, 1]} : vector<2x4x256xf32> to vector<2x4x239xf32>
    %51 = vector.extract_strided_slice %0 {offsets = [0, 0, 0], sizes = [2, 4, 17], strides = [1, 1, 1]} : vector<2x4x256xf32> to vector<2x4x17xf32>
    %52 = tpu.concatenate %50, %51 in 2 : vector<2x4x239xf32>, vector<2x4x17xf32> -> vector<2x4x256xf32>
    %c8 = arith.constant 8 : index
    %c0_10 = arith.constant 0 : index
    %53 = vector.load %arg4[%c8, %c0_10] : memref<9x256xf32, #tpu.memory_space<vmem>>, vector<1x256xf32>
    %54 = vector.shape_cast %53 : vector<1x256xf32> to vector<1x1x256xf32>
    %55 = vector.broadcast %54 : vector<1x1x256xf32> to vector<2x4x256xf32>
    %56 = arith.mulf %52, %55 : vector<2x4x256xf32>
    %57 = tpu.concatenate %7, %14, %21, %28, %0, %35, %42, %49, %56 in 1 : vector<2x4x256xf32>, vector<2x4x256xf32>, vector<2x4x256xf32>, vector<2x4x256xf32>, vector<2x4x256xf32>, vector<2x4x256xf32>, vector<2x4x256xf32>, vector<2x4x256xf32>, vector<2x4x256xf32> -> vector<2x36x256xf32>
    %c0_11 = arith.constant 0 : index
    %c0_12 = arith.constant 0 : index
    %58 = vector.load %arg2[%c0_11, %c0_12] : memref<16x36xf32, #tpu.memory_space<vmem>>, vector<16x36xf32>
    %c0_13 = arith.constant 0 : index
    %c0_14 = arith.constant 0 : index
    %59 = vector.load %arg3[%c0_13, %c0_14] : memref<16x1xf32, #tpu.memory_space<vmem>>, vector<16x1xf32>
    %60 = vector.extract_strided_slice %57 {offsets = [0, 0, 0], sizes = [1, 36, 256], strides = [1, 1, 1]} : vector<2x36x256xf32> to vector<1x36x256xf32>
    %61 = vector.shape_cast %60 : vector<1x36x256xf32> to vector<36x256xf32>
    %cst = arith.constant dense<0.000000e+00> : vector<16x256xf32>
    %62 = tpu.matmul %58, %61, %cst {dimension_numbers = #tpu.dot_dimension_numbers<[1], [0], [0], [1], [0, 0, 1, 1], [], []>} : vector<16x36xf32>, vector<36x256xf32>, vector<16x256xf32> -> vector<16x256xf32>
    %63 = vector.broadcast %59 : vector<16x1xf32> to vector<16x256xf32>
    %64 = arith.addf %62, %63 : vector<16x256xf32>
    %c0_15 = arith.constant 0 : index
    %c0_16 = arith.constant 0 : index
    %c0_17 = arith.constant 0 : index
    %65 = vector.load %arg5[%c0_15, %c0_16, %c0_17] : memref<2x16x256xf32, #tpu.memory_space<vmem>>, vector<1x16x256xf32>
    %66 = vector.shape_cast %65 : vector<1x16x256xf32> to vector<16x256xf32>
    %67 = vector.shape_cast %64 : vector<16x256xf32> to vector<1x16x256xf32>
    tpu.vector_store %arg5[%c0_15, %c0_16, %c0_17], %67 {strides = array<i32>} : memref<2x16x256xf32, #tpu.memory_space<vmem>>, vector<1x16x256xf32>,
    %68 = vector.extract_strided_slice %57 {offsets = [1, 0, 0], sizes = [1, 36, 256], strides = [1, 1, 1]} : vector<2x36x256xf32> to vector<1x36x256xf32>
    %69 = vector.shape_cast %68 : vector<1x36x256xf32> to vector<36x256xf32>
    %cst_18 = arith.constant dense<0.000000e+00> : vector<16x256xf32>
    %70 = tpu.matmul %58, %69, %cst_18 {dimension_numbers = #tpu.dot_dimension_numbers<[1], [0], [0], [1], [0, 0, 1, 1], [], []>} : vector<16x36xf32>, vector<36x256xf32>, vector<16x256xf32> -> vector<16x256xf32>
    %71 = vector.broadcast %59 : vector<16x1xf32> to vector<16x256xf32>
    %72 = arith.addf %70, %71 : vector<16x256xf32>
    %c1_19 = arith.constant 1 : index
    %c0_20 = arith.constant 0 : index
    %c0_21 = arith.constant 0 : index
    %73 = vector.load %arg5[%c1_19, %c0_20, %c0_21] : memref<2x16x256xf32, #tpu.memory_space<vmem>>, vector<1x16x256xf32>
    %74 = vector.shape_cast %73 : vector<1x16x256xf32> to vector<16x256xf32>
    %75 = vector.shape_cast %72 : vector<16x256xf32> to vector<1x16x256xf32>
    tpu.vector_store %arg5[%c1_19, %c0_20, %c0_21], %75 {strides = array<i32>} : memref<2x16x256xf32, #tpu.memory_space<vmem>>, vector<1x16x256xf32>,
    return
  }
  func.func @transform_0(%arg0: i32) -> (i32, i32, i32) {
    %c0_i32 = arith.constant 0 : i32
    %c0_i32_0 = arith.constant 0 : i32
    %c0_i32_1 = arith.constant 0 : i32
    return %arg0, %c0_i32, %c0_i32_0 : i32, i32, i32
  }
  func.func @transform_1(%arg0: i32) -> (i32, i32) {
    %c0_i32 = arith.constant 0 : i32
    %c0_i32_0 = arith.constant 0 : i32
    %c0_i32_1 = arith.constant 0 : i32
    return %c0_i32, %c0_i32_0 : i32, i32
  }
  func.func @transform_2(%arg0: i32) -> (i32, i32) {
    %c0_i32 = arith.constant 0 : i32
    %c0_i32_0 = arith.constant 0 : i32
    %c0_i32_1 = arith.constant 0 : i32
    return %c0_i32, %c0_i32_0 : i32, i32
  }
  func.func @transform_3(%arg0: i32) -> (i32, i32) {
    %c0_i32 = arith.constant 0 : i32
    %c0_i32_0 = arith.constant 0 : i32
    %c0_i32_1 = arith.constant 0 : i32
    return %c0_i32, %c0_i32_0 : i32, i32
  }
  func.func @transform_4(%arg0: i32) -> (i32, i32, i32) {
    %c0_i32 = arith.constant 0 : i32
    %c0_i32_0 = arith.constant 0 : i32
    %c0_i32_1 = arith.constant 0 : i32
    return %arg0, %c0_i32, %c0_i32_0 : i32, i32, i32
  }
}

</mosaic_0001>

<bundles_post_ra>
// kernel: tpu_custom_call.1
= control target key start
LH: loop header
LB: loop body
LE: loop exit
PB: predicated region body
PF: predicated region fallthrough
CT: control target
= control target key end

     0   :  { %9 = vsyncpa [#allocation3], 0  ;;  %s1034_s0 = inlined_call_operand.vmem [shape: f32[2,4,256], index: 0, kind: input, shape index: {}]   ;;  %s1035_s1 = inlined_call_operand.hbm [shape: f32[16,36], index: 1, kind: input, shape index: {}]   ;;  %s1036_s2 = inlined_call_operand.vmem [shape: f32[16,1], index: 2, kind: input, shape index: {}]   ;;  %s1037_s3 = inlined_call_operand.hbm [shape: f32[9,256], index: 3, kind: input, shape index: {}]   ;;  %s1038_s4 = inlined_call_operand.hbm [shape: f32[2,16,256], index: 4, kind: output, shape index: {}]  }
   0x1   :  { %10 = vsyncpa [#allocation6], 0 }
   0x2   :  { %11 = vsyncpa [#allocation4], 0  ;;  %s18_s17 = sshll.u32 %s1035_s1, 4  ;;  %s758_s18 = smov [#allocation2]   ;;  %s19_s17 = int_to_ptr.hbm [resolvable:$true] %s18_s17 }
   0x3   :  { %s20_s19 = sshll.u32 %s758_s18, 4  ;;  %s33_s22 = sshll.u32 %s1037_s3, 4  ;;  %s21_s19 = int_to_ptr.vmem [resolvable:$true] %s20_s19  ;;  %s34_s22 = int_to_ptr.hbm [resolvable:$true] %s33_s22 }
   0x4   :  { %s759_s23 = smov 128   ;;  %s760_s24 = smov 8  }
   0x5   :  { %26 = dma.hbm_to_vmem [thread:$0]  %s19_s17, 256, %s21_s19, [#allocation3], %s759_s23, %s759_s23, %s760_s24  }
   0x6   :  { %s761_s25 = smov [#allocation5]   ;;  %s762_s27 = smov 256  }
   0x7   :  { %s35_s26 = sshll.u32 %s761_s25, 4  ;;  %s763_s28 = smov 16   ;;  %s36_s26 = int_to_ptr.vmem [resolvable:$true] %s35_s26 }
   0x8   :  { %41 = dma.hbm_to_vmem [thread:$0]  %s34_s22, 512, %s36_s26, [#allocation6], %s762_s27, %s762_s27, %s763_s28  }
   0x9   :  { %752 = dma.done.wait [#allocation3], 256  }
   0xa   :  { %753 = vsyncadd [#allocation3], 4294967040 }
   0xb   :  { %754 = dma.done.wait [#allocation6], 512  }
   0xc   :  { %755 = vsyncadd [#allocation6], 4294966784  ;;  %v810_v0 = vld [vmem:[%s1034_s0 + $0x8] sm:$0xff]  ;;  %v815_v1 = vld [vmem:[%s1034_s0] sm:$0xff]  ;;  %s764_s5 = smov 17   ;;  %s765_s0 = smov 15  }
   0xd   :  { %57 = vst [vmem:[#allocation1 + $0x10] ss:$2 sm:$0xff] %v810_v0  ;;  %s766_s6 = smov 1   ;;  %s767_s7 = smov 127   ;;  %vm80_vm0 = vcmask 138240   ;;  %vm125_vm1 = vcmask 130048  }
   0xe   :  { %54 = vst [vmem:[#allocation1] ss:$2 sm:$0xff] %v815_v1  ;;  %s768_s8 = smov 113   ;;  %s769_s9 = smov 112   ;;  %vm480_vm2 = vcmask 1043456   ;;  %vm171_vm3 = vcmask 121856  }
   0xf   :  { %s770_s10 = smov 111   ;;  %v870_v59 = vld [vmem:[#allocation5 + $0x1] ss:$8 sm:$0x3]  ;;  %vm217_vm4 = vcmask 7168   ;;  %vm390_vm5 = vcmask 908288  }
  0x10   :  { %v872_v60 = vld [vmem:[#allocation5] ss:$8 sm:$0x3]  ;;  %v137_v61 = vperm.slane %v870_v59, 0  ;;  %v138_v62 = vperm.slane %v870_v59, 1  ;;  %vm252_vm6 = vcmask 1039360  }
  0x11   :  { %v91_v63 = vperm.slane %v872_v60, 0  ;;  %vm298_vm7 = vcmask 924672   ;;  %vm344_vm8 = vcmask 916480   ;;  %vm511_vm9 = vcmask 293888   ;;  %s637_s18 = sshll.u32 %s1038_s4, 4  ;;  %s638_s18 = int_to_ptr.hbm [resolvable:$true] %s637_s18 }
  0x14   :  { %v58_v2 = vld.sshfl [vmem:[#allocation1 + $0x18] sm:$0xff pattern:$0x75316420] }
  0x15   :  { %61 = vrot.lane.b32.xlu0 %v58_v2, %s764_s5  ;;  %69 = vst [vmem:[#allocation1 + $0x10] ss:$2 sm:$0xff] %v810_v0  ;;  %v821_v3 = vld.sshfl [vmem:[#allocation1 + $0x8] sm:$0xff pattern:$0x75316420] }
  0x16   :  { %65 = vst [vmem:[#allocation1] ss:$2 sm:$0xff] %v815_v1 }
  0x1c   :  { %v70_v4 = vld.sshfl [vmem:[#allocation1 + $0x10] sm:$0xff pattern:$0x75316420]  ;;  %v71_v5 = vld.sshfl [vmem:[#allocation1 + $0x18] sm:$0xff pattern:$0x75316420] }
  0x1d   :  { %76 = vrot.lane.b32.xlu1 %v70_v4, %s764_s5  ;;  %102 = vst [vmem:[#allocation1 + $0x10] ss:$2 sm:$0xff] %v810_v0  ;;  %v826_v6 = vld.sshfl [vmem:[#allocation1] sm:$0xff pattern:$0x75316420]  ;;  %78 = vrot.lane.b32.xlu2 %v71_v5, %s764_s5 }
  0x1e   :  { %v829_v7 = vld.sshfl [vmem:[#allocation1 + $0x8] sm:$0xff pattern:$0x75316420] }
  0x1f   :  { %99 = vst [vmem:[#allocation1] ss:$2 sm:$0xff] %v815_v1 }
  0x24   :  { %v103_v8 = vld.sshfl [vmem:[#allocation1 + $0x18] sm:$0xff pattern:$0x75316420] }
  0x25   :  { %106 = vrot.lane.b32.xlu0 %v103_v8, %s763_s28  ;;  %114 = vst [vmem:[#allocation1 + $0x10] ss:$2 sm:$0xff] %v810_v0 }
  0x26   :  { %v100_v9 = vld.sshfl [vmem:[#allocation1 + $0x8] sm:$0xff pattern:$0x75316420] }
  0x27   :  { %110 = vst [vmem:[#allocation1] ss:$2 sm:$0xff] %v815_v1 }
  0x2c   :  { %v115_v10 = vld.sshfl [vmem:[#allocation1 + $0x10] sm:$0xff pattern:$0x75316420]  ;;  %v116_v11 = vld.sshfl [vmem:[#allocation1 + $0x18] sm:$0xff pattern:$0x75316420] }
  0x2d   :  { %121 = vrot.lane.b32.xlu1 %v115_v10, %s763_s28  ;;  %148 = vst [vmem:[#allocation1 + $0x10] ss:$2 sm:$0xff] %v810_v0  ;;  %104 = vrot.lane.b32.xlu0 %v100_v9, %s763_s28 }
  0x2e   :  { %v111_v12 = vld.sshfl [vmem:[#allocation1] sm:$0xff pattern:$0x75316420]  ;;  %v112_v13 = vld.sshfl [vmem:[#allocation1 + $0x8] sm:$0xff pattern:$0x75316420]  ;;  %123 = vrot.lane.b32.xlu2 %v116_v11, %s763_s28 }
  0x2f   :  { %145 = vst [vmem:[#allocation1] ss:$2 sm:$0xff] %v815_v1 }
  0x34   :  { %v149_v14 = vld.sshfl [vmem:[#allocation1 + $0x18] sm:$0xff pattern:$0x75316420] }
  0x35   :  { %152 = vrot.lane.b32.xlu0 %v149_v14, %s765_s0  ;;  %160 = vst [vmem:[#allocation1 + $0x10] ss:$2 sm:$0xff] %v810_v0  ;;  %117 = vrot.lane.b32.xlu1 %v111_v12, %s763_s28 }
  0x36   :  { %v146_v15 = vld.sshfl [vmem:[#allocation1 + $0x8] sm:$0xff pattern:$0x75316420]  ;;  %119 = vrot.lane.b32.xlu2 %v112_v13, %s763_s28 }
  0x37   :  { %156 = vst [vmem:[#allocation1] ss:$2 sm:$0xff] %v815_v1 }
  0x3c   :  { %v161_v16 = vld.sshfl [vmem:[#allocation1 + $0x10] sm:$0xff pattern:$0x75316420]  ;;  %v162_v17 = vld.sshfl [vmem:[#allocation1 + $0x18] sm:$0xff pattern:$0x75316420] }
  0x3d   :  { %167 = vrot.lane.b32.xlu1 %v161_v16, %s765_s0  ;;  %150 = vrot.lane.b32.xlu0 %v146_v15, %s765_s0  ;;  %194 = vst [vmem:[#allocation1 + $0x10] ss:$2 sm:$0xff] %v810_v0 }
  0x3e   :  { %v157_v18 = vld.sshfl [vmem:[#allocation1] sm:$0xff pattern:$0x75316420]  ;;  %169 = vrot.lane.b32.xlu2 %v162_v17, %s765_s0  ;;  %v158_v19 = vld.sshfl [vmem:[#allocation1 + $0x8] sm:$0xff pattern:$0x75316420] }
  0x3f   :  { %191 = vst [vmem:[#allocation1] ss:$2 sm:$0xff] %v815_v1 }
  0x44   :  { %v195_v20 = vld.sshfl [vmem:[#allocation1 + $0x18] sm:$0xff pattern:$0x75316420] }
  0x45   :  { %198 = vrot.lane.b32.xlu0 %v195_v20, %s766_s6  ;;  %206 = vst [vmem:[#allocation1 + $0x10] ss:$2 sm:$0xff] %v810_v0  ;;  %163 = vrot.lane.b32.xlu1 %v157_v18, %s765_s0 }
  0x46   :  { %v192_v21 = vld.sshfl [vmem:[#allocation1 + $0x8] sm:$0xff pattern:$0x75316420]  ;;  %165 = vrot.lane.b32.xlu2 %v158_v19, %s765_s0 }
  0x47   :  { %202 = vst [vmem:[#allocation1] ss:$2 sm:$0xff] %v815_v1 }
  0x4c   :  { %v207_v22 = vld.sshfl [vmem:[#allocation1 + $0x10] sm:$0xff pattern:$0x75316420]  ;;  %v208_v23 = vld.sshfl [vmem:[#allocation1 + $0x18] sm:$0xff pattern:$0x75316420] }
  0x4d   :  { %213 = vrot.lane.b32.xlu1 %v207_v22, %s766_s6  ;;  %241 = vst [vmem:[#allocation1 + $0x10] ss:$2 sm:$0xff] %v810_v0  ;;  %196 = vrot.lane.b32.xlu0 %v192_v21, %s766_s6 }
  0x4e   :  { %v203_v24 = vld.sshfl [vmem:[#allocation1] sm:$0xff pattern:$0x75316420]  ;;  %v204_v25 = vld.sshfl [vmem:[#allocation1 + $0x8] sm:$0xff pattern:$0x75316420]  ;;  %215 = vrot.lane.b32.xlu2 %v208_v23, %s766_s6 }
  0x4f   :  { %237 = vst [vmem:[#allocation1] ss:$2 sm:$0xff] %v815_v1 }
  0x54   :  { %v242_v26 = vld.sshfl [vmem:[#allocation1 + $0x10] sm:$0xff pattern:$0x75316420]  ;;  %v243_v27 = vld.sshfl [vmem:[#allocation1 + $0x18] sm:$0xff pattern:$0x75316420] }
  0x55   :  { %248 = vrot.lane.b32.xlu0 %v242_v26, %s767_s7  ;;  %209 = vrot.lane.b32.xlu1 %v203_v24, %s766_s6  ;;  %262 = vst [vmem:[#allocation1 + $0x10] ss:$2 sm:$0xff] %v810_v0 }
  0x56   :  { %v238_v28 = vld.sshfl [vmem:[#allocation1] sm:$0xff pattern:$0x75316420]  ;;  %211 = vrot.lane.b32.xlu2 %v204_v25, %s766_s6  ;;  %v239_v29 = vld.sshfl [vmem:[#allocation1 + $0x8] sm:$0xff pattern:$0x75316420] }
  0x57   :  { %259 = vst [vmem:[#allocation1] ss:$2 sm:$0xff] %v815_v1 }
  0x5c   :  { %v263_v30 = vld.sshfl [vmem:[#allocation1 + $0x10] sm:$0xff pattern:$0x75316420] }
  0x5d   :  { %250 = vrot.lane.b32.xlu1 %v243_v27, %s767_s7  ;;  %287 = vst [vmem:[#allocation1 + $0x10] ss:$2 sm:$0xff] %v810_v0  ;;  %244 = vrot.lane.b32.xlu0 %v238_v28, %s767_s7 }
  0x5e   :  { %v260_v31 = vld.sshfl [vmem:[#allocation1] sm:$0xff pattern:$0x75316420]  ;;  %266 = vrot.lane.b32.xlu2 %v263_v30, %s767_s7 }
  0x5f   :  { %283 = vst [vmem:[#allocation1] ss:$2 sm:$0xff] %v815_v1  ;;  %v181_v30 = vld [vmem:[#allocation5 + $0x2] ss:$8 sm:$0x3] }
  0x64   :  { %v288_v32 = vld.sshfl [vmem:[#allocation1 + $0x10] sm:$0xff pattern:$0x75316420]  ;;  %v289_v33 = vld.sshfl [vmem:[#allocation1 + $0x18] sm:$0xff pattern:$0x75316420] }
  0x65   :  { %246 = vrot.lane.b32.xlu1 %v239_v29, %s767_s7  ;;  %294 = vrot.lane.b32.xlu0 %v288_v32, %s768_s8  ;;  %308 = vst [vmem:[#allocation1 + $0x10] ss:$2 sm:$0xff] %v810_v0  ;;  %v227_v29 = vld [vmem:[#allocation5 + $0x3] ss:$8 sm:$0x3] }
  0x66   :  { %v284_v34 = vld.sshfl [vmem:[#allocation1] sm:$0xff pattern:$0x75316420]  ;;  %264 = vrot.lane.b32.xlu2 %v260_v31, %s767_s7  ;;  %v285_v35 = vld.sshfl [vmem:[#allocation1 + $0x8] sm:$0xff pattern:$0x75316420] }
  0x67   :  { %305 = vst [vmem:[#allocation1] ss:$2 sm:$0xff] %v815_v1  ;;  %v229_v31 = vperm.slane %v227_v29, 0  ;;  %v230_v32 = vperm.slane %v227_v29, 1 }
  0x68   :  { %v943_v29 = vld [vmem:[#allocation5 + $0x6] ss:$8 sm:$0x3] }
  0x6c   :  { %v309_v36 = vld.sshfl [vmem:[#allocation1 + $0x10] sm:$0xff pattern:$0x75316420] }
  0x6d   :  { %296 = vrot.lane.b32.xlu1 %v289_v33, %s768_s8  ;;  %333 = vst [vmem:[#allocation1 + $0x10] ss:$2 sm:$0xff] %v810_v0  ;;  %290 = vrot.lane.b32.xlu0 %v284_v34, %s768_s8  ;;  %v183_v33 = vperm.slane %v181_v30, 0  ;;  %v184_v34 = vperm.slane %v181_v30, 1 }
  0x6e   :  { %v306_v37 = vld.sshfl [vmem:[#allocation1] sm:$0xff pattern:$0x75316420]  ;;  %312 = vrot.lane.b32.xlu2 %v309_v36, %s768_s8 }
  0x6f   :  { %329 = vst [vmem:[#allocation1] ss:$2 sm:$0xff] %v815_v1  ;;  %v365_v30 = vld [vmem:[#allocation5 + $0x7] ss:$8 sm:$0x3] }
  0x74   :  { %v334_v38 = vld.sshfl [vmem:[#allocation1 + $0x10] sm:$0xff pattern:$0x75316420]  ;;  %v335_v39 = vld.sshfl [vmem:[#allocation1 + $0x18] sm:$0xff pattern:$0x75316420] }
  0x75   :  { %292 = vrot.lane.b32.xlu1 %v285_v35, %s768_s8  ;;  %340 = vrot.lane.b32.xlu0 %v334_v38, %s769_s9  ;;  %354 = vst [vmem:[#allocation1 + $0x10] ss:$2 sm:$0xff] %v810_v0 }
  0x76   :  { %v331_v40 = vld.sshfl [vmem:[#allocation1 + $0x8] sm:$0xff pattern:$0x75316420]  ;;  %310 = vrot.lane.b32.xlu2 %v306_v37, %s768_s8  ;;  %v330_v41 = vld.sshfl [vmem:[#allocation1] sm:$0xff pattern:$0x75316420] }
  0x77   :  { %351 = vst [vmem:[#allocation1] ss:$2 sm:$0xff] %v815_v1  ;;  %v79_v44 = vpop.permute.xlu2 %78 }
  0x7c   :  { %v355_v42 = vld.sshfl [vmem:[#allocation1 + $0x10] sm:$0xff pattern:$0x75316420] }
  0x7d   :  { %342 = vrot.lane.b32.xlu0 %v335_v39, %s769_s9  ;;  %338 = vrot.lane.b32.xlu1 %v331_v40, %s769_s9  ;;  %379 = vst [vmem:[#allocation1 + $0x10] ss:$2 sm:$0xff] %v810_v0 }
  0x7e   :  { %v352_v43 = vld.sshfl [vmem:[#allocation1] sm:$0xff pattern:$0x75316420] }
  0x7f   :  { %356 = vrot.lane.b32.xlu2 %v352_v43, %s769_s9  ;;  %375 = vst [vmem:[#allocation1] ss:$2 sm:$0xff] %v815_v1 }
  0x84   :  { %v380_v45 = vld.sshfl [vmem:[#allocation1 + $0x10] sm:$0xff pattern:$0x75316420]  ;;  %v381_v46 = vld.sshfl [vmem:[#allocation1 + $0x18] sm:$0xff pattern:$0x75316420] }
  0x85   :  { %358 = vrot.lane.b32.xlu1 %v355_v42, %s769_s9  ;;  %336 = vrot.lane.b32.xlu0 %v330_v41, %s769_s9  ;;  %400 = vst [vmem:[#allocation1 + $0x10] ss:$2 sm:$0xff] %v810_v0 }
  0x86   :  { %v377_v47 = vld.sshfl [vmem:[#allocation1 + $0x8] sm:$0xff pattern:$0x75316420]  ;;  %v376_v48 = vld.sshfl [vmem:[#allocation1] sm:$0xff pattern:$0x75316420] }
  0x87   :  { %388 = vrot.lane.b32.xlu2 %v381_v46, %s770_s10  ;;  %397 = vst [vmem:[#allocation1] ss:$2 sm:$0xff] %v815_v1  ;;  %v62_v51 = vpop.permute.xlu0 %61 }
  0x88   :  { %v124_v49 = vpop.permute.xlu2 %123 }
  0x8c   :  { %v401_v50 = vld.sshfl [vmem:[#allocation1 + $0x10] sm:$0xff pattern:$0x75316420] }
  0x8d   :  { %386 = vrot.lane.b32.xlu1 %v380_v45, %s770_s10  ;;  %382 = vrot.lane.b32.xlu0 %v376_v48, %s770_s10  ;;  %449 = vst [vmem:[#allocation1 + $0x10] ss:$2 sm:$0xff] %v810_v0  ;;  %v92_v0 = vperm.slane %v872_v60, 1 }
  0x8e   :  { %v398_v52 = vld.sshfl [vmem:[#allocation1] sm:$0xff pattern:$0x75316420] }
  0x8f   :  { %v77_v53 = vpop.permute.xlu1 %76  ;;  %404 = vrot.lane.b32.xlu2 %v401_v50, %s770_s10  ;;  %445 = vst [vmem:[#allocation1] ss:$2 sm:$0xff] %v815_v1 }
  0x90   :  { %v82_v54 = vsel %vm80_vm0, %v77_v53, %v79_v44  ;;  %v88_v55 = vsel %vm80_vm0, %v62_v51, %v77_v53  ;;  %v120_v56 = vpop.permute.xlu2 %119 }
  0x91   :  { %v97_v9 = vmul.f32 %v91_v63, %v88_v55  ;;  %v98_v10 = vmul.f32 %v92_v0, %v82_v54 }
  0x95   :  { %384 = vrot.lane.b32.xlu1 %v377_v47, %s770_s10  ;;  %59 = vrot.lane.b32.xlu0 %v821_v3, %s764_s5 }
  0x97   :  { %v107_v57 = vpop.permute.xlu0 %106  ;;  %402 = vrot.lane.b32.xlu2 %v398_v52, %s770_s10 }
  0x98   :  { %v170_v58 = vpop.permute.xlu2 %169 }
  0x9d   :  { %72 = vrot.lane.b32.xlu1 %v826_v6, %s764_s5 }
  0x9f   :  { %v122_v1 = vpop.permute.xlu1 %121  ;;  %v105_v2 = vpop.permute.xlu0 %104  ;;  %74 = vrot.lane.b32.xlu2 %v829_v7, %s764_s5 }
  0xa0   :  { %v127_v3 = vsel %vm125_vm1, %v122_v1, %v124_v49  ;;  %v133_v4 = vsel %vm125_vm1, %v107_v57, %v122_v1  ;;  %v166_v5 = vpop.permute.xlu2 %165 }
  0xa1   :  { %v143_v6 = vmul.f32 %v137_v61, %v133_v4  ;;  %v144_v8 = vmul.f32 %v138_v62, %v127_v3 }
  0xa3   :  { %v427_v11 = vrot.slane %v143_v6, 4  ;;  %v428_v7 = vrot.slane %v144_v8, 4 }
  0xa5   :  { %v893_v12 = vsel %vm480_vm2, %v98_v10, %v428_v7  ;;  %v896_v13 = vsel %vm480_vm2, %v97_v9, %v427_v11 }
  0xa7   :  { %v153_v14 = vpop.permute.xlu0 %152  ;;  %v118_v15 = vpop.permute.xlu1 %117 }
  0xa8   :  { %v899_v16 = vsel %vm125_vm1, %v118_v15, %v120_v56  ;;  %v902_v17 = vsel %vm125_vm1, %v105_v2, %v118_v15  ;;  %v216_v18 = vpop.permute.xlu2 %215 }
  0xaf   :  { %v168_v19 = vpop.permute.xlu1 %167  ;;  %v151_v20 = vpop.permute.xlu0 %150 }
  0xb0   :  { %v173_v21 = vsel %vm171_vm3, %v168_v19, %v170_v58  ;;  %v179_v22 = vsel %vm171_vm3, %v153_v14, %v168_v19  ;;  %v212_v23 = vpop.permute.xlu2 %211  ;;  %v930_v14 = vld [vmem:[#allocation5 + $0x10] ss:$8 sm:$0x3] }
  0xb1   :  { %v189_v42 = vmul.f32 %v183_v33, %v179_v22  ;;  %v190_v43 = vmul.f32 %v184_v34, %v173_v21  ;;  %v414_v19 = vperm.slane %v930_v14, 1 }
  0xb7   :  { %v199_v24 = vpop.permute.xlu0 %198  ;;  %v164_v25 = vpop.permute.xlu1 %163 }
  0xb8   :  { %v172_v26 = vsel %vm171_vm3, %v164_v25, %v166_v5  ;;  %v178_v27 = vsel %vm171_vm3, %v151_v20, %v164_v25  ;;  %v267_v28 = vpop.permute.xlu2 %266 }
  0xb9   :  { %v187_v55 = vmul.f32 %v183_v33, %v178_v27  ;;  %v188_v56 = vmul.f32 %v184_v34, %v172_v26  ;;  %v368_v33 = vperm.slane %v365_v30, 1 }
  0xbf   :  { %v214_v35 = vpop.permute.xlu1 %213  ;;  %v197_v36 = vpop.permute.xlu0 %196 }
  0xc0   :  { %v219_v37 = vsel %vm217_vm4, %v214_v35, %v216_v18  ;;  %v225_v38 = vsel %vm217_vm4, %v199_v24, %v214_v35  ;;  %v906_v39 = vpop.permute.xlu2 %264  ;;  %v939_v24 = vld [vmem:[#allocation5 + $0x5] ss:$8 sm:$0x3] }
  0xc1   :  { %v235_v40 = vmul.f32 %v229_v31, %v225_v38  ;;  %v236_v41 = vmul.f32 %v230_v32, %v219_v37  ;;  %v276_v26 = vperm.slane %v939_v24, 1 }
  0xc3   :  { %v439_v44 = vrot.slane %v235_v40, 4  ;;  %v440_v45 = vrot.slane %v236_v41, 4 }
  0xc5   :  { %v909_v46 = vsel %vm480_vm2, %v190_v43, %v440_v45  ;;  %v912_v47 = vsel %vm480_vm2, %v189_v42, %v439_v44 }
  0xc7   :  { %v249_v48 = vpop.permute.xlu0 %248  ;;  %v210_v49 = vpop.permute.xlu1 %209 }
  0xc8   :  { %v218_v50 = vsel %vm217_vm4, %v210_v49, %v212_v23  ;;  %v224_v51 = vsel %vm217_vm4, %v197_v36, %v210_v49  ;;  %v313_v52 = vpop.permute.xlu2 %312  ;;  %v367_v36 = vperm.slane %v365_v30, 0 }
  0xc9   :  { %v233_v53 = vmul.f32 %v229_v31, %v224_v51  ;;  %v234_v54 = vmul.f32 %v230_v32, %v218_v50  ;;  %v322_v32 = vperm.slane %v943_v29, 1  ;;  %v451_v50 = vld.sshfl [vmem:[#allocation1 + $0x18] sm:$0xff pattern:$0x75316420] }
  0xcb   :  { %v437_v57 = vrot.slane %v233_v53, 4  ;;  %v438_v58 = vrot.slane %v234_v54, 4  ;;  %v499_v53 = vld [vmem:[%s1036_s2] sm:$0xff] }
  0xcd   :  { %v917_v1 = vsel %vm480_vm2, %v187_v55, %v437_v57  ;;  %v920_v2 = vsel %vm480_vm2, %v188_v56, %v438_v58  ;;  %v321_v55 = vperm.slane %v943_v29, 0  ;;  %v771_v56 = vmov 0  }
  0xce   :  { %678 = vset.pattern.permute.xlu0 %v771_v56  ;;  %679 = vset.pattern.permute.xlu1 %v771_v56  ;;  %v142_v29 = vmul.f32 %v138_v62, %v899_v16 }
  0xcf   :  { %v251_v3 = vpop.permute.xlu1 %250  ;;  %v922_v4 = vpop.permute.xlu0 %244  ;;  %503 = vperm.xlu0 %678, %v499_v53  }
  0xd0   :  { %v924_v5 = vpop.permute.xlu2 %310  ;;  %v271_v27 = vsel %vm252_vm6, %v251_v3, %v267_v28  ;;  %v275_v28 = vperm.slane %v939_v24, 0  ;;  %v254_v41 = vsel %vm252_vm6, %v249_v48, %v251_v3  ;;  %v500_v48 = vld [vmem:[%s1036_s2 + $0x8] sm:$0xff]  ;;  %v426_v16 = vrot.slane %v142_v29, 4  ;;  %s772_s2 = smov [#allocation7]  }
  0xd1   :  { %v282_v31 = vmul.f32 %v276_v26, %v271_v27  ;;  %508 = vperm.xlu1 %679, %v500_v48   ;;  %s635_s15 = sshll.u32 %s772_s2, 4  ;;  %s636_s15 = int_to_ptr.vmem [resolvable:$true] %s635_s15 }
  0xd2   :  { %v281_v54 = vmul.f32 %v275_v28, %v254_v41 }
  0xd3   :  { %v463_v42 = vrot.slane %v282_v31, 4 }
  0xd5   :  { %v492_v3 = vsel %vm480_vm2, %v451_v50, %v463_v42 }
  0xd7   :  { %v926_v6 = vpop.permute.xlu1 %246  ;;  %v295_v8 = vpop.permute.xlu0 %294 }
  0xd9   :  { %v357_v9 = vpop.permute.xlu2 %356 }
  0xdf   :  { %v297_v10 = vpop.permute.xlu1 %296  ;;  %v928_v11 = vpop.permute.xlu0 %290 }
  0xe0   :  { %v317_v35 = vsel %vm298_vm7, %v297_v10, %v313_v52  ;;  %v413_v52 = vperm.slane %v930_v14, 0  ;;  %v300_v57 = vsel %vm298_vm7, %v295_v8, %v297_v10  ;;  %v968_v8 = vld [vmem:[#allocation2] sm:$0xff]  ;;  %v253_v10 = vsel %vm252_vm6, %v922_v4, %v926_v6 }
  0xe1   :  { %v389_v7 = vpop.permute.xlu2 %388  ;;  %v328_v43 = vmul.f32 %v322_v32, %v317_v35  ;;  %v327_v27 = vmul.f32 %v321_v55, %v300_v57  ;;  %v279_v4 = vmul.f32 %v275_v28, %v253_v10 }
  0xe3   :  { %v460_v41 = vrot.slane %v279_v4, 4 }
  0xe7   :  { %v932_v15 = vpop.permute.xlu1 %292  ;;  %v341_v18 = vpop.permute.xlu0 %340 }
  0xe9   :  { %v405_v20 = vpop.permute.xlu2 %404 }
  0xea   :  { %v409_v21 = vsel %vm390_vm5, %v389_v7, %v405_v20 }
  0xeb   :  { %v420_v22 = vmul.f32 %v414_v19, %v409_v21 }
  0xed   :  { %660 = vmatpush.msk.msra.mxu3 %vm480_vm2, %v420_v22 }
  0xef   :  { %v339_v23 = vpop.permute.xlu1 %338  ;;  %v343_v25 = vpop.permute.xlu0 %342 }
  0xf0   :  { %v346_v38 = vsel %vm344_vm8, %v341_v18, %v343_v25  ;;  %v362_v21 = vsel %vm344_vm8, %v339_v23, %v357_v9  ;;  %v450_v9 = vld.sshfl [vmem:[#allocation1 + $0x10] sm:$0xff pattern:$0x75316420] }
  0xf1   :  { %v373_v49 = vmul.f32 %v367_v36, %v346_v38  ;;  %v403_v30 = vpop.permute.xlu2 %402  ;;  %v372_v31 = vmul.f32 %v368_v33, %v362_v21 }
  0xf3   :  { %v474_v18 = vrot.slane %v373_v49, 4 }
  0xf7   :  { %v359_v34 = vpop.permute.xlu1 %358  ;;  %v337_v45 = vpop.permute.xlu0 %336 }
  0xf8   :  { %v363_v37 = vsel %vm344_vm8, %v343_v25, %v359_v34  ;;  %v345_v22 = vsel %vm344_vm8, %v337_v45, %v339_v23  ;;  %v462_v25 = vrot.slane %v281_v54, 4 }
  0xf9   :  { %v374_v40 = vmul.f32 %v368_v33, %v363_v37  ;;  %v371_v34 = vmul.f32 %v367_v36, %v345_v22  ;;  %v473_v33 = vrot.slane %v372_v31, 4  ;;  %v75_v45 = vpop.permute.xlu2 %74 }
  0xfa   :  { %v491_v37 = vsel %vm480_vm2, %v450_v9, %v462_v25 }
  0xfb   :  { %v475_v44 = vrot.slane %v374_v40, 4  ;;  %v472_v36 = vrot.slane %v371_v34, 4 }
  0xfd   :  { %v496_v51 = vsel %vm480_vm2, %v328_v43, %v475_v44  ;;  %v447_v43 = vld.sshfl [vmem:[#allocation1 + $0x8] sm:$0xff pattern:$0x75316420]  ;;  %v498_v44 = vld [vmem:[#allocation2 + $0x8] sm:$0xff] }
  0xfe   :  { %615 = vmatpush.msra.mxu3 %v496_v51 }
  0xff   :  { %v387_v58 = vpop.permute.xlu1 %386  ;;  %v383_v23 = vpop.permute.xlu0 %382 }
 0x100   :  { %v392_v20 = vsel %vm390_vm5, %v387_v58, %v389_v7  ;;  %616 = vmatpush.msra.mxu3 %v492_v3  ;;  %v270_v7 = vsel %vm252_vm6, %v926_v6, %v906_v39  ;;  %v299_v39 = vsel %vm298_vm7, %v928_v11, %v932_v15  ;;  %v316_v6 = vsel %vm298_vm7, %v932_v15, %v924_v5  ;;  %v446_v15 = vld.sshfl [vmem:[#allocation1] sm:$0xff pattern:$0x75316420] }
 0x101   :  { %v419_v24 = vmul.f32 %v413_v52, %v392_v20  ;;  %v280_v35 = vmul.f32 %v276_v26, %v270_v7  ;;  %v325_v42 = vmul.f32 %v321_v55, %v299_v39  ;;  %v326_v5 = vmul.f32 %v322_v32, %v316_v6 }
 0x102   :  { %617 = vmatpush.msra.mxu3 %v909_v46  ;;  %v495_v46 = vsel %vm480_vm2, %v327_v27, %v474_v18 }
 0x103   :  { %657 = vmatpush.msk.msra.mxu2 %vm480_vm2, %v419_v24  ;;  %v461_v11 = vrot.slane %v280_v35, 4  ;;  %v494_v14 = vsel %vm480_vm2, %v326_v5, %v473_v33 }
 0x104   :  { %618 = vmatpush.msra.mxu3 %v893_v12 }
 0x105   :  { %592 = vmatpush.msra.mxu2 %v495_v46  ;;  %661 = vmatmul.msk.f32.vlgmr.msra.gmra.mxu3 %vm511_vm9, %v968_v8  ;;  %v490_v49 = vsel %vm480_vm2, %v447_v43, %v461_v11 }
 0x107   :  { %593 = vmatpush.msra.mxu2 %v491_v37  ;;  %v385_v12 = vpop.permute.xlu1 %384  ;;  %v60_v32 = vpop.permute.xlu0 %59 }
 0x108   :  { %v391_v38 = vsel %vm390_vm5, %v383_v23, %v385_v12  ;;  %v408_v40 = vsel %vm390_vm5, %v385_v12, %v403_v30 }
 0x109   :  { %594 = vmatpush.msra.mxu2 %v912_v47  ;;  %v417_v26 = vmul.f32 %v413_v52, %v391_v38  ;;  %v418_v28 = vmul.f32 %v414_v19, %v408_v40  ;;  %v493_v47 = vsel %vm480_vm2, %v325_v42, %v472_v36  ;;  %v141_v19 = vmul.f32 %v137_v61, %v902_v17 }
 0x10b   :  { %651 = vmatpush.msk.msra.mxu0 %vm480_vm2, %v417_v26  ;;  %654 = vmatpush.msk.msra.mxu1 %vm480_vm2, %v418_v28  ;;  %v425_v62 = vrot.slane %v141_v19, 4 }
 0x10c   :  { %595 = vmatpush.msra.mxu2 %v896_v13  ;;  %v489_v13 = vsel %vm480_vm2, %v446_v15, %v460_v41 }
 0x10d   :  { %536 = vmatpush.msra.mxu0 %v493_v47  ;;  %559 = vmatpush.msra.mxu1 %v494_v14 }
 0x10e   :  { %658 = vmatmul.msk.f32.vlgmr.msra.gmra.mxu2 %vm511_vm9, %v968_v8  ;;  %662 = vmatmul.msk.f32.gmra.mxu3 %vm511_vm9, %v498_v44 }
 0x10f   :  { %v73_v50 = vpop.permute.xlu1 %72  ;;  %537 = vmatpush.msra.mxu0 %v489_v13  ;;  %560 = vmatpush.msra.mxu1 %v490_v49 }
 0x110   :  { %v87_v61 = vsel %vm80_vm0, %v60_v32, %v73_v50  ;;  %v81_v59 = vsel %vm80_vm0, %v73_v50, %v75_v45 }
 0x111   :  { %v95_v17 = vmul.f32 %v91_v63, %v87_v61  ;;  %v96_v51 = vmul.f32 %v92_v0, %v81_v59  ;;  %538 = vmatpush.msra.mxu0 %v917_v1  ;;  %561 = vmatpush.msra.mxu1 %v920_v2 }
 0x113   :  { %v481_v52 = vsel %vm480_vm2, %v95_v17, %v425_v62  ;;  %v482_v53 = vsel %vm480_vm2, %v96_v51, %v426_v16 }
 0x114   :  { %539 = vmatpush.msra.mxu0 %v481_v52  ;;  %562 = vmatpush.msra.mxu1 %v482_v53 }
 0x115   :  { %652 = vmatmul.msk.f32.vlgmr.msra.gmra.mxu0 %vm511_vm9, %v968_v8  ;;  %655 = vmatmul.msk.f32.vlgmr.msra.gmra.mxu1 %vm511_vm9, %v968_v8 }
 0x116   :  { %659 = vmatmul.msk.f32.gmra.mxu2 %vm511_vm9, %v498_v44 }
 0x11d   :  { %653 = vmatmul.msk.f32.gmra.mxu0 %vm511_vm9, %v498_v44  ;;  %656 = vmatmul.msk.f32.gmra.mxu1 %vm511_vm9, %v498_v44 }
 0x141   :  { %v504_v60 = vpop.permute.xlu0 %503 }
 0x143   :  { %v509_v1 = vpop.permute.xlu1 %508 }
 0x188   :  { %v620_v63 = vpop.f32.mrf.mxu3 }
 0x189   :  { %v621_v0 = vadd.f32 %v620_v63, %v504_v60 }
 0x18b   :  { %628 = vst [vmem:[#allocation7 + $0x28] sm:$0xff] %v621_v0 }
 0x191   :  { %v597_v2 = vpop.f32.mrf.mxu2  ;;  %v623_v48 = vpop.f32.mrf.mxu3 }
 0x192   :  { %v598_v54 = vadd.f32 %v597_v2, %v504_v60  ;;  %v541_v55 = vpop.f32.mrf.mxu0  ;;  %v564_v56 = vpop.f32.mrf.mxu1  ;;  %v624_v3 = vadd.f32 %v623_v48, %v509_v1 }
 0x193   :  { %v542_v57 = vadd.f32 %v541_v55, %v504_v60  ;;  %v565_v58 = vadd.f32 %v564_v56, %v504_v60 }
 0x194   :  { %627 = vst [vmem:[#allocation7 + $0x20] sm:$0xff] %v598_v54 }
 0x195   :  { %570 = vst [vmem:[#allocation7] sm:$0xff] %v542_v57 }
 0x196   :  { %571 = vst [vmem:[#allocation7 + $0x8] sm:$0xff] %v565_v58 }
 0x197   :  { %630 = vst [vmem:[#allocation7 + $0x38] sm:$0xff] %v624_v3 }
 0x199   :  { %v600_v18 = vpop.f32.mrf.mxu2 }
 0x19a   :  { %v601_v20 = vadd.f32 %v600_v18, %v509_v1  ;;  %v544_v21 = vpop.f32.mrf.mxu0  ;;  %v567_v22 = vpop.f32.mrf.mxu1 }
 0x19b   :  { %v545_v24 = vadd.f32 %v544_v21, %v509_v1  ;;  %v568_v25 = vadd.f32 %v567_v22, %v509_v1 }
 0x19c   :  { %629 = vst [vmem:[#allocation7 + $0x30] sm:$0xff] %v601_v20 }
 0x19d   :  { %572 = vst [vmem:[#allocation7 + $0x10] sm:$0xff] %v545_v24 }
 0x19e   :  { %573 = vst [vmem:[#allocation7 + $0x18] sm:$0xff] %v568_v25 }
 0x19f   :  { %643 = dma.vmem_to_hbm [thread:$0]  %s636_s15, 1024, %s638_s18, [#allocation4], %s762_s27, %s762_s27, %s763_s28  }
 0x1a0   :  { %756 = dma.done.wait [#allocation4], 1024  }
 0x1a1   :  { %757 = vsyncadd [#allocation4], 4294966272 }
 0x1a2   :  { %648 = vsyncpa [#allocation3], 1 }
 0x1a3   :  { %649 = vsyncpa [#allocation6], 1 }
 0x1a4   :  { %650 = vsyncpa [#allocation4], 1 }

</bundles_post_ra>
